<compile_context>
chip_gen: v5e
topology: v5e:2x2
jax: 0.10.0
libtpu: 0.0.40
codegen_flags: <defaults>
</compile_context>

<pallas_src>
import functools

import jax
import jax.numpy as jnp
from jax.experimental import pallas as pl
from jax.experimental.pallas import tpu as pltpu

_LANE = 128


def _round_up(n, m):
    return ((n + m - 1) // m) * m


def _fused_mlp_kernel(*refs, layer_modes, eps, mxu_dtype):
    """refs = (x, w0, p0, w1, p1, ..., o).  p_s rows = [bias, gamma, beta]."""
    n_layers = len(layer_modes)
    x_ref = refs[0]
    o_ref = refs[1 + 2 * n_layers]

    h = x_ref[...]
    for s, mode in enumerate(layer_modes):
        w = refs[1 + 2 * s][...]
        p = refs[2 + 2 * s][...]  # (3, Dpad_out): bias / gamma / beta

        lhs, rhs = h, w
        if mxu_dtype is not None:
            lhs = lhs.astype(mxu_dtype)
            rhs = rhs.astype(mxu_dtype)
        h = jnp.dot(lhs, rhs, preferred_element_type=jnp.float32)

        if mode == "bn_relu":
            # Linear bias omitted: exactly cancelled by the batch-mean
            # subtraction of training-mode BatchNorm1d.
            mean = jnp.mean(h, axis=0, keepdims=True)
            centered = h - mean
            var = jnp.mean(centered * centered, axis=0, keepdims=True)
            h = centered * jax.lax.rsqrt(var + eps)
            h = h * p[1:2, :] + p[2:3, :]          # gamma, beta
            h = jnp.maximum(h, 0.0)
        elif mode == "relu":                        # no-BN hidden layer
            h = h + p[0:1, :]                       # bias
            h = jnp.maximum(h, 0.0)
        else:                                       # final Linear
            h = h + p[0:1, :]

    o_ref[...] = h.astype(o_ref.dtype)


def mlp_forward(x, params, batch_norm=True, *, eps=1e-5, mxu_dtype=None):
    """Fused forward pass of the whole MLP in one pallas_call.

    params: list of (w (in,out), b (out,), gamma (out,), beta (out,)).
    """
    n_layers = len(params)
    B, d_in = x.shape
    assert d_in == params[0][0].shape[0]

    layer_modes = []
    call_args = [x]
    in_specs = [pl.BlockSpec((B, d_in), lambda i: (0, 0))]

    prev_p = d_in  # padded width of the current activation (x is unpadded)
    for s, (w, b, gamma, beta) in enumerate(params):
        din, dout = w.shape
        dout_p = _round_up(dout, _LANE)

        wp = jnp.zeros((prev_p, dout_p), jnp.float32).at[:din, :dout].set(w)
        pp = (jnp.zeros((3, dout_p), jnp.float32)
              .at[0, :dout].set(b)
              .at[1, :dout].set(gamma)
              .at[2, :dout].set(beta))

        call_args += [wp, pp]
        in_specs += [
            pl.BlockSpec((prev_p, dout_p), lambda i: (0, 0)),
            pl.BlockSpec((3, dout_p), lambda i: (0, 0)),
        ]

        is_last = s == n_layers - 1
        if is_last:
            layer_modes.append("linear")
        elif batch_norm:
            layer_modes.append("bn_relu")
        else:
            layer_modes.append("relu")
        prev_p = dout_p

    dout_last = params[-1][0].shape[1]
    out_p = prev_p

    kernel = functools.partial(
        _fused_mlp_kernel,
        layer_modes=tuple(layer_modes), eps=eps, mxu_dtype=mxu_dtype)

    out_padded = pl.pallas_call(
        kernel,
        out_shape=jax.ShapeDtypeStruct((B, out_p), jnp.float32),
        grid=(1,),
        in_specs=in_specs,
        out_specs=pl.BlockSpec((B, out_p), lambda i: (0, 0)),
        compiler_params=pltpu.CompilerParams(
            dimension_semantics=("arbitrary",)),
    )(*call_args)

    return out_padded[:, :dout_last]


def init_mlp_params(key, sizes):
    """Deterministic params mimicking the torch module's shapes/init."""
    params = []
    for s in range(len(sizes) - 1):
        fan_in, fan_out = sizes[s], sizes[s + 1]
        key, kw, kb = jax.random.split(key, 3)
        bound = 1.0 / (fan_in ** 0.5)
        # stored as (in, out): transpose of torch's (out, in) Linear weight.
        w = jax.random.uniform(kw, (fan_in, fan_out), jnp.float32, -bound, bound)
        b = jax.random.uniform(kb, (fan_out,), jnp.float32, -bound, bound)
        gamma = jnp.ones((fan_out,), jnp.float32)   # BN weight default
        beta = jnp.zeros((fan_out,), jnp.float32)   # BN bias default
        params.append((w, b, gamma, beta))
    return params


def _mlp_forward_ref(x, params, batch_norm=True, eps=1e-5):
    """Pure-JAX reference (training-mode BN forward, matching torch)."""
    n_layers = len(params)
    h = x
    for s, (w, b, gamma, beta) in enumerate(params):
        h = jnp.dot(h, w, precision=jax.lax.Precision.HIGHEST) + b
        if s < n_layers - 1:
            if batch_norm:
                mean = jnp.mean(h, axis=0, keepdims=True)
                var = jnp.mean((h - mean) ** 2, axis=0, keepdims=True)
                h = (h - mean) * jax.lax.rsqrt(var + eps)
                h = h * gamma + beta
            h = jnp.maximum(h, 0.0)
    return h


if __name__ == "__main__":
    sizes = [16, 32, 32, 8]
    batch = 8

    key = jax.random.PRNGKey(0)
    key, kx = jax.random.split(key)
    x = jax.random.normal(kx, (batch, sizes[0]), jnp.float32)
    params = init_mlp_params(key, sizes)

    # batch_norm=True path (Linear -> BN -> ReLU, ..., final Linear)
    out = jax.block_until_ready(mlp_forward(x, params, batch_norm=True))
    assert out.shape == (batch, sizes[-1]), out.shape
    ref = _mlp_forward_ref(x, params, batch_norm=True)
    assert bool(jnp.all(jnp.isfinite(out)))
    assert jnp.allclose(out, ref, rtol=2e-2, atol=2e-2), \
        float(jnp.max(jnp.abs(out - ref)))

    # batch_norm=False path (Linear -> ReLU, ..., final Linear)
    out2 = jax.block_until_ready(mlp_forward(x, params, batch_norm=False))
    ref2 = _mlp_forward_ref(x, params, batch_norm=False)
    assert out2.shape == (batch, sizes[-1]), out2.shape
    assert jnp.allclose(out2, ref2, rtol=2e-2, atol=2e-2), \
        float(jnp.max(jnp.abs(out2 - ref2)))

    print("KERNEL_OK")
</pallas_src>

<mosaic_0001>
module attributes {stable_mosaic.version = 11 : i64} {
  func.func @_fused_mlp_kernel(%arg0: i32, %arg1: memref<8x16xf32, #tpu.memory_space<vmem>>, %arg2: memref<16x128xf32, #tpu.memory_space<vmem>>, %arg3: memref<3x128xf32, #tpu.memory_space<vmem>>, %arg4: memref<128x128xf32, #tpu.memory_space<vmem>>, %arg5: memref<3x128xf32, #tpu.memory_space<vmem>>, %arg6: memref<128x128xf32, #tpu.memory_space<vmem>>, %arg7: memref<3x128xf32, #tpu.memory_space<vmem>>, %arg8: memref<8x128xf32, #tpu.memory_space<vmem>>) attributes {dimension_semantics = [#tpu.dimension_semantics<arbitrary>], iteration_bounds = array<i64: 1>, scalar_prefetch = 0 : i64, scratch_operands = 0 : i64, tpu.core_type = #tpu.core_type<tc>, window_params = [{pipeline_mode = #tpu.pipeline_mode<synchronous>, transform_indices = @transform_0, window_bounds = array<i64: 8, 16>}, {pipeline_mode = #tpu.pipeline_mode<synchronous>, transform_indices = @transform_1, window_bounds = array<i64: 16, 128>}, {pipeline_mode = #tpu.pipeline_mode<synchronous>, transform_indices = @transform_2, window_bounds = array<i64: 3, 128>}, {pipeline_mode = #tpu.pipeline_mode<synchronous>, transform_indices = @transform_3, window_bounds = array<i64: 128, 128>}, {pipeline_mode = #tpu.pipeline_mode<synchronous>, transform_indices = @transform_4, window_bounds = array<i64: 3, 128>}, {pipeline_mode = #tpu.pipeline_mode<synchronous>, transform_indices = @transform_5, window_bounds = array<i64: 128, 128>}, {pipeline_mode = #tpu.pipeline_mode<synchronous>, transform_indices = @transform_6, window_bounds = array<i64: 3, 128>}, {pipeline_mode = #tpu.pipeline_mode<synchronous>, transform_indices = @transform_7, window_bounds = array<i64: 8, 128>}]} {
    %c0 = arith.constant 0 : index
    %c0_0 = arith.constant 0 : index
    %0 = vector.load %arg1[%c0, %c0_0] : memref<8x16xf32, #tpu.memory_space<vmem>>, vector<8x16xf32>
    %c0_1 = arith.constant 0 : index
    %c0_2 = arith.constant 0 : index
    %1 = vector.load %arg2[%c0_1, %c0_2] : memref<16x128xf32, #tpu.memory_space<vmem>>, vector<16x128xf32>
    %c0_3 = arith.constant 0 : index
    %c0_4 = arith.constant 0 : index
    %2 = vector.load %arg3[%c0_3, %c0_4] : memref<3x128xf32, #tpu.memory_space<vmem>>, vector<3x128xf32>
    %cst = arith.constant dense<0.000000e+00> : vector<8x128xf32>
    %3 = tpu.matmul %0, %1, %cst {dimension_numbers = #tpu.dot_dimension_numbers<[1], [0], [0], [1], [0, 0, 1, 1], [], []>} : vector<8x16xf32>, vector<16x128xf32>, vector<8x128xf32> -> vector<8x128xf32>
    %cst_5 = arith.constant dense<0.000000e+00> : vector<128xf32>
    %4 = vector.multi_reduction <add>, %3, %cst_5 [0] : vector<8x128xf32> to vector<128xf32>
    %5 = vector.shape_cast %4 : vector<128xf32> to vector<1x128xf32>
    %cst_6 = arith.constant 8.000000e+00 : f32
    %6 = vector.broadcast %cst_6 : f32 to vector<1x128xf32>
    %7 = arith.divf %5, %6 : vector<1x128xf32>
    %8 = vector.broadcast %7 : vector<1x128xf32> to vector<8x128xf32>
    %9 = arith.subf %3, %8 : vector<8x128xf32>
    %10 = arith.mulf %9, %9 : vector<8x128xf32>
    %cst_7 = arith.constant dense<0.000000e+00> : vector<128xf32>
    %11 = vector.multi_reduction <add>, %10, %cst_7 [0] : vector<8x128xf32> to vector<128xf32>
    %12 = vector.shape_cast %11 : vector<128xf32> to vector<1x128xf32>
    %cst_8 = arith.constant 8.000000e+00 : f32
    %13 = vector.broadcast %cst_8 : f32 to vector<1x128xf32>
    %14 = arith.divf %12, %13 : vector<1x128xf32>
    %cst_9 = arith.constant 9.99999974E-6 : f32
    %15 = vector.broadcast %cst_9 : f32 to vector<1x128xf32>
    %16 = arith.addf %14, %15 : vector<1x128xf32>
    %17 = math.rsqrt %16 : vector<1x128xf32>
    %18 = vector.broadcast %17 : vector<1x128xf32> to vector<8x128xf32>
    %19 = arith.mulf %9, %18 : vector<8x128xf32>
    %20 = vector.extract_strided_slice %2 {offsets = [1, 0], sizes = [1, 128], strides = [1, 1]} : vector<3x128xf32> to vector<1x128xf32>
    %21 = vector.broadcast %20 : vector<1x128xf32> to vector<8x128xf32>
    %22 = arith.mulf %19, %21 : vector<8x128xf32>
    %23 = vector.extract_strided_slice %2 {offsets = [2, 0], sizes = [1, 128], strides = [1, 1]} : vector<3x128xf32> to vector<1x128xf32>
    %24 = vector.broadcast %23 : vector<1x128xf32> to vector<8x128xf32>
    %25 = arith.addf %22, %24 : vector<8x128xf32>
    %cst_10 = arith.constant 0.000000e+00 : f32
    %26 = vector.broadcast %cst_10 : f32 to vector<8x128xf32>
    %27 = arith.maximumf %25, %26 : vector<8x128xf32>
    %c0_11 = arith.constant 0 : index
    %c0_12 = arith.constant 0 : index
    %28 = vector.load %arg4[%c0_11, %c0_12] : memref<128x128xf32, #tpu.memory_space<vmem>>, vector<128x128xf32>
    %c0_13 = arith.constant 0 : index
    %c0_14 = arith.constant 0 : index
    %29 = vector.load %arg5[%c0_13, %c0_14] : memref<3x128xf32, #tpu.memory_space<vmem>>, vector<3x128xf32>
    %cst_15 = arith.constant dense<0.000000e+00> : vector<8x128xf32>
    %30 = tpu.matmul %27, %28, %cst_15 {dimension_numbers = #tpu.dot_dimension_numbers<[1], [0], [0], [1], [0, 0, 1, 1], [], []>} : vector<8x128xf32>, vector<128x128xf32>, vector<8x128xf32> -> vector<8x128xf32>
    %cst_16 = arith.constant dense<0.000000e+00> : vector<128xf32>
    %31 = vector.multi_reduction <add>, %30, %cst_16 [0] : vector<8x128xf32> to vector<128xf32>
    %32 = vector.shape_cast %31 : vector<128xf32> to vector<1x128xf32>
    %cst_17 = arith.constant 8.000000e+00 : f32
    %33 = vector.broadcast %cst_17 : f32 to vector<1x128xf32>
    %34 = arith.divf %32, %33 : vector<1x128xf32>
    %35 = vector.broadcast %34 : vector<1x128xf32> to vector<8x128xf32>
    %36 = arith.subf %30, %35 : vector<8x128xf32>
    %37 = arith.mulf %36, %36 : vector<8x128xf32>
    %cst_18 = arith.constant dense<0.000000e+00> : vector<128xf32>
    %38 = vector.multi_reduction <add>, %37, %cst_18 [0] : vector<8x128xf32> to vector<128xf32>
    %39 = vector.shape_cast %38 : vector<128xf32> to vector<1x128xf32>
    %cst_19 = arith.constant 8.000000e+00 : f32
    %40 = vector.broadcast %cst_19 : f32 to vector<1x128xf32>
    %41 = arith.divf %39, %40 : vector<1x128xf32>
    %cst_20 = arith.constant 9.99999974E-6 : f32
    %42 = vector.broadcast %cst_20 : f32 to vector<1x128xf32>
    %43 = arith.addf %41, %42 : vector<1x128xf32>
    %44 = math.rsqrt %43 : vector<1x128xf32>
    %45 = vector.broadcast %44 : vector<1x128xf32> to vector<8x128xf32>
    %46 = arith.mulf %36, %45 : vector<8x128xf32>
    %47 = vector.extract_strided_slice %29 {offsets = [1, 0], sizes = [1, 128], strides = [1, 1]} : vector<3x128xf32> to vector<1x128xf32>
    %48 = vector.broadcast %47 : vector<1x128xf32> to vector<8x128xf32>
    %49 = arith.mulf %46, %48 : vector<8x128xf32>
    %50 = vector.extract_strided_slice %29 {offsets = [2, 0], sizes = [1, 128], strides = [1, 1]} : vector<3x128xf32> to vector<1x128xf32>
    %51 = vector.broadcast %50 : vector<1x128xf32> to vector<8x128xf32>
    %52 = arith.addf %49, %51 : vector<8x128xf32>
    %cst_21 = arith.constant 0.000000e+00 : f32
    %53 = vector.broadcast %cst_21 : f32 to vector<8x128xf32>
    %54 = arith.maximumf %52, %53 : vector<8x128xf32>
    %c0_22 = arith.constant 0 : index
    %c0_23 = arith.constant 0 : index
    %55 = vector.load %arg6[%c0_22, %c0_23] : memref<128x128xf32, #tpu.memory_space<vmem>>, vector<128x128xf32>
    %c0_24 = arith.constant 0 : index
    %c0_25 = arith.constant 0 : index
    %56 = vector.load %arg7[%c0_24, %c0_25] : memref<3x128xf32, #tpu.memory_space<vmem>>, vector<3x128xf32>
    %cst_26 = arith.constant dense<0.000000e+00> : vector<8x128xf32>
    %57 = tpu.matmul %54, %55, %cst_26 {dimension_numbers = #tpu.dot_dimension_numbers<[1], [0], [0], [1], [0, 0, 1, 1], [], []>} : vector<8x128xf32>, vector<128x128xf32>, vector<8x128xf32> -> vector<8x128xf32>
    %58 = vector.extract_strided_slice %56 {offsets = [0, 0], sizes = [1, 128], strides = [1, 1]} : vector<3x128xf32> to vector<1x128xf32>
    %59 = vector.broadcast %58 : vector<1x128xf32> to vector<8x128xf32>
    %60 = arith.addf %57, %59 : vector<8x128xf32>
    %c0_27 = arith.constant 0 : index
    %c0_28 = arith.constant 0 : index
    %61 = vector.load %arg8[%c0_27, %c0_28] : memref<8x128xf32, #tpu.memory_space<vmem>>, vector<8x128xf32>
    tpu.vector_store %arg8[%c0_27, %c0_28], %60 {strides = array<i32>} : memref<8x128xf32, #tpu.memory_space<vmem>>, vector<8x128xf32>,
    return
  }
  func.func @transform_0(%arg0: i32) -> (i32, i32) {
    %c0_i32 = arith.constant 0 : i32
    %c0_i32_0 = arith.constant 0 : i32
    %c0_i32_1 = arith.constant 0 : i32
    return %c0_i32, %c0_i32_0 : i32, i32
  }
  func.func @transform_1(%arg0: i32) -> (i32, i32) {
    %c0_i32 = arith.constant 0 : i32
    %c0_i32_0 = arith.constant 0 : i32
    %c0_i32_1 = arith.constant 0 : i32
    return %c0_i32, %c0_i32_0 : i32, i32
  }
  func.func @transform_2(%arg0: i32) -> (i32, i32) {
    %c0_i32 = arith.constant 0 : i32
    %c0_i32_0 = arith.constant 0 : i32
    %c0_i32_1 = arith.constant 0 : i32
    return %c0_i32, %c0_i32_0 : i32, i32
  }
  func.func @transform_3(%arg0: i32) -> (i32, i32) {
    %c0_i32 = arith.constant 0 : i32
    %c0_i32_0 = arith.constant 0 : i32
    %c0_i32_1 = arith.constant 0 : i32
    return %c0_i32, %c0_i32_0 : i32, i32
  }
  func.func @transform_4(%arg0: i32) -> (i32, i32) {
    %c0_i32 = arith.constant 0 : i32
    %c0_i32_0 = arith.constant 0 : i32
    %c0_i32_1 = arith.constant 0 : i32
    return %c0_i32, %c0_i32_0 : i32, i32
  }
  func.func @transform_5(%arg0: i32) -> (i32, i32) {
    %c0_i32 = arith.constant 0 : i32
    %c0_i32_0 = arith.constant 0 : i32
    %c0_i32_1 = arith.constant 0 : i32
    return %c0_i32, %c0_i32_0 : i32, i32
  }
  func.func @transform_6(%arg0: i32) -> (i32, i32) {
    %c0_i32 = arith.constant 0 : i32
    %c0_i32_0 = arith.constant 0 : i32
    %c0_i32_1 = arith.constant 0 : i32
    return %c0_i32, %c0_i32_0 : i32, i32
  }
  func.func @transform_7(%arg0: i32) -> (i32, i32) {
    %c0_i32 = arith.constant 0 : i32
    %c0_i32_0 = arith.constant 0 : i32
    %c0_i32_1 = arith.constant 0 : i32
    return %c0_i32, %c0_i32_0 : i32, i32
  }
}

</mosaic_0001>

<bundles_post_ra>
// kernel: tpu_custom_call.1
= control target key start
LH: loop header
LB: loop body
LE: loop exit
PB: predicated region body
PF: predicated region fallthrough
CT: control target
= control target key end

     0   :  { %12 = vsyncpa [#allocation3], 0  ;;  %s596_s0 = inlined_call_operand.hbm [shape: f32[8,16], index: 0, kind: input, shape index: {}]   ;;  %s597_s1 = inlined_call_operand.hbm [shape: f32[16,128], index: 1, kind: input, shape index: {}]   ;;  %s598_s2 = inlined_call_operand.hbm [shape: f32[3,128], index: 2, kind: input, shape index: {}]   ;;  %s599_s3 = inlined_call_operand.hbm [shape: f32[128,128], index: 3, kind: input, shape index: {}]   ;;  %s600_s4 = inlined_call_operand.hbm [shape: f32[3,128], index: 4, kind: input, shape index: {}]   ;;  %s601_s5 = inlined_call_operand.hbm [shape: f32[128,128], index: 5, kind: input, shape index: {}]   ;;  %s602_s6 = inlined_call_operand.vmem [shape: f32[3,128], index: 6, kind: input, shape index: {}]   ;;  %s603_s7 = inlined_call_operand.hbm [shape: f32[8,128], index: 7, kind: output, shape index: {}]  }
   0x1   :  { %13 = vsyncpa [#allocation6], 0 }
   0x2   :  { %14 = vsyncpa [#allocation9], 0 }
   0x3   :  { %15 = vsyncpa [#allocation12], 0  ;;  %s32_s26 = sshll.u32 %s597_s1, 4  ;;  %s33_s26 = int_to_ptr.hbm [resolvable:$true] %s32_s26 }
   0x4   :  { %16 = vsyncpa [#allocation4], 0  ;;  %s507_s27 = smov [#allocation5]   ;;  %s56_s8 = sshll.u32 %s599_s3, 4  ;;  %s57_s8 = int_to_ptr.hbm [resolvable:$true] %s56_s8 }
   0x5   :  { %s34_s28 = sshll.u32 %s507_s27, 4  ;;  %s508_s9 = smov 128   ;;  %s35_s28 = int_to_ptr.vmem [resolvable:$true] %s34_s28 }
   0x6   :  { %s509_s10 = smov 8   ;;  %s510_s11 = smov [#allocation8]  }
   0x7   :  { %40 = dma.hbm_to_vmem [thread:$0]  %s33_s26, 256, %s35_s28, [#allocation6], %s508_s9, %s508_s9, %s509_s10  }
   0x8   :  { %s58_s12 = sshll.u32 %s510_s11, 4  ;;  %s22_s14 = sshll.u32 %s596_s0, 4  ;;  %s59_s12 = int_to_ptr.vmem [resolvable:$true] %s58_s12  ;;  %s23_s14 = int_to_ptr.hbm [resolvable:$true] %s22_s14 }
   0x9   :  { %64 = dma.hbm_to_vmem [thread:$0]  %s57_s8, 2048, %s59_s12, [#allocation9], %s508_s9, %s508_s9, %s509_s10  }
   0xa   :  { %s46_s16 = sshll.u32 %s598_s2, 4  ;;  %s511_s17 = smov [#allocation2]   ;;  %s47_s16 = int_to_ptr.hbm [resolvable:$true] %s46_s16 }
   0xb   :  { %s24_s18 = sshll.u32 %s511_s17, 4  ;;  %s512_s19 = smov [#allocation7]   ;;  %s25_s18 = int_to_ptr.vmem [resolvable:$true] %s24_s18 }
   0xc   :  { %27 = dma.hbm_to_vmem [thread:$0]  %s23_s14, 128, %s25_s18, [#allocation3]  }
   0xd   :  { %s48_s20 = sshll.u32 %s512_s19, 4  ;;  %s70_s0 = sshll.u32 %s600_s4, 4  ;;  %s49_s20 = int_to_ptr.vmem [resolvable:$true] %s48_s20  ;;  %s71_s0 = int_to_ptr.hbm [resolvable:$true] %s70_s0 }
   0xe   :  { %51 = dma.hbm_to_vmem [thread:$0]  %s47_s16, 64, %s49_s20, [#allocation6]  }
   0xf   :  { %s80_s25 = sshll.u32 %s601_s5, 4  ;;  %s513_s26 = smov [#allocation10]   ;;  %s81_s25 = int_to_ptr.hbm [resolvable:$true] %s80_s25 }
  0x10   :  { %s72_s2 = sshll.u32 %s513_s26, 4  ;;  %s514_s27 = smov [#allocation11]   ;;  %s73_s2 = int_to_ptr.vmem [resolvable:$true] %s72_s2 }
  0x11   :  { %75 = dma.hbm_to_vmem [thread:$0]  %s71_s0, 64, %s73_s2, [#allocation9]  }
  0x12   :  { %s82_s28 = sshll.u32 %s514_s27, 4  ;;  %s83_s28 = int_to_ptr.vmem [resolvable:$true] %s82_s28 }
  0x13   :  { %88 = dma.hbm_to_vmem [thread:$0]  %s81_s25, 2048, %s83_s28, [#allocation12], %s508_s9, %s508_s9, %s509_s10  }
  0x14   :  { %497 = dma.done.wait [#allocation3], 128  }
  0x15   :  { %498 = vsyncadd [#allocation3], 4294967168 }
  0x16   :  { %499 = dma.done.wait [#allocation6], 320  }
  0x17   :  { %500 = vsyncadd [#allocation6], 4294966976 }
  0x18   :  { %501 = dma.done.wait [#allocation9], 2112  }
  0x19   :  { %502 = vsyncadd [#allocation9], 4294965184 }
  0x1a   :  { %503 = dma.done.wait [#allocation12], 2048  }
  0x1b   :  { %504 = vsyncadd [#allocation12], 4294965248  ;;  %v117_v0 = vld [vmem:[#allocation5 + $0x8] sm:$0xff]  ;;  %v116_v1 = vld [vmem:[#allocation5] sm:$0xff]  ;;  %vm119_vm0 = vcmask 130048   ;;  %v515_v3 = vmov 8.0  }
  0x1c   :  { %137 = vmatpush.msra.mxu0 %v117_v0  ;;  %v115_v2 = vld [vmem:[#allocation2] sm:$0xff]  ;;  %323 = vrcp.f32 %v515_v3  ;;  %v198_v6 = vld [vmem:[#allocation8 + $0x78] sm:$0xff]  ;;  %v197_v8 = vld [vmem:[#allocation8 + $0x70] sm:$0xff]  ;;  %s516_s29 = smov [#allocation13]   ;;  %s299_s10 = sshll.u32 %s603_s7, 4  ;;  %s300_s10 = int_to_ptr.hbm [resolvable:$true] %s299_s10 }
  0x1d   :  { %200 = vmatpush.msra.mxu1 %v198_v6  ;;  %v196_v11 = vld [vmem:[#allocation8 + $0x68] sm:$0xff]  ;;  %v195_v14 = vld [vmem:[#allocation8 + $0x60] sm:$0xff]  ;;  %v194_v16 = vld [vmem:[#allocation8 + $0x58] sm:$0xff]  ;;  %s297_s30 = sshll.u32 %s516_s29, 4  ;;  %s298_s30 = int_to_ptr.vmem [resolvable:$true] %s297_s30 }
  0x1e   :  { %138 = vmatpush.msra.mxu0 %v116_v1  ;;  %v193_v19 = vld [vmem:[#allocation8 + $0x50] sm:$0xff]  ;;  %v192_v21 = vld [vmem:[#allocation8 + $0x48] sm:$0xff]  ;;  %v191_v24 = vld [vmem:[#allocation8 + $0x40] sm:$0xff] }
  0x1f   :  { %312 = vmatmul.msk.f32.vlgmr.msra.gmra.mxu0 %vm119_vm0, %v115_v2  ;;  %201 = vmatpush.msra.mxu1 %v197_v8  ;;  %v190_v26 = vld [vmem:[#allocation8 + $0x38] sm:$0xff]  ;;  %v189_v28 = vld [vmem:[#allocation8 + $0x30] sm:$0xff]  ;;  %v188_v30 = vld [vmem:[#allocation8 + $0x28] sm:$0xff] }
  0x20   :  { %v187_v32 = vld [vmem:[#allocation8 + $0x20] sm:$0xff]  ;;  %v186_v34 = vld [vmem:[#allocation8 + $0x18] sm:$0xff]  ;;  %v185_v35 = vld [vmem:[#allocation8 + $0x10] sm:$0xff] }
  0x21   :  { %202 = vmatpush.msra.mxu1 %v196_v11  ;;  %v184_v37 = vld [vmem:[#allocation8 + $0x8] sm:$0xff]  ;;  %v183_v39 = vld [vmem:[#allocation8] sm:$0xff]  ;;  %v118_v49 = vld [vmem:[#allocation7] sm:$0x7] }
  0x22   :  { %v324_v4 = vpop.eup %323  ;;  %v178_v51 = vperm.slane %v118_v49, 1  ;;  %v180_v54 = vperm.slane %v118_v49, 2  ;;  %v268_v58 = vld [vmem:[#allocation11 + $0x78] sm:$0xff]  ;;  %v267_v59 = vld [vmem:[#allocation11 + $0x70] sm:$0xff]  ;;  %v266_v62 = vld [vmem:[#allocation11 + $0x68] sm:$0xff] }
  0x23   :  { %v150_v5 = vmul.f32 8.0, %v324_v4  ;;  %203 = vmatpush.msra.mxu1 %v195_v14  ;;  %vm154_vm1 = vweird.f32 %v324_v4  ;;  %271 = vmatpush.msra.mxu2 %v268_v58  ;;  %v265_v0 = vld [vmem:[#allocation11 + $0x60] sm:$0xff]  ;;  %v264_v2 = vld [vmem:[#allocation11 + $0x58] sm:$0xff]  ;;  %v262_v6 = vld [vmem:[#allocation11 + $0x48] sm:$0xff] }
  0x24   :  { %v261_v8 = vld [vmem:[#allocation11 + $0x40] sm:$0xff]  ;;  %v258_v14 = vld [vmem:[#allocation11 + $0x28] sm:$0xff] }
  0x25   :  { %v151_v7 = vsub.f32 1.0, %v150_v5  ;;  %204 = vmatpush.msra.mxu1 %v194_v16  ;;  %272 = vmatpush.msra.mxu2 %v267_v59  ;;  %v257_v16 = vld [vmem:[#allocation11 + $0x20] sm:$0xff] }
  0x27   :  { %v152_v12 = vmul.f32 %v324_v4, %v151_v7  ;;  %205 = vmatpush.msra.mxu1 %v193_v19  ;;  %273 = vmatpush.msra.mxu2 %v266_v62  ;;  %v255_v19 = vld [vmem:[#allocation11 + $0x10] sm:$0xff] }
  0x29   :  { %v153_v17 = vadd.f32 %v324_v4, %v152_v12  ;;  %206 = vmatpush.msra.mxu1 %v192_v21  ;;  %274 = vmatpush.msra.mxu2 %v265_v0  ;;  %v259_v12 = vld [vmem:[#allocation11 + $0x30] sm:$0xff]  ;;  %v254_v21 = vld [vmem:[#allocation11 + $0x8] sm:$0xff] }
  0x2b   :  { %v584_v22 = vsel %vm154_vm1, %v324_v4, %v153_v17  ;;  %207 = vmatpush.msra.mxu1 %v191_v24  ;;  %275 = vmatpush.msra.mxu2 %v264_v2  ;;  %v263_v4 = vld [vmem:[#allocation11 + $0x50] sm:$0xff]  ;;  %v253_v24 = vld [vmem:[#allocation11] sm:$0xff] }
  0x2d   :  { %208 = vmatpush.msra.mxu1 %v190_v26  ;;  %276 = vmatpush.msra.mxu2 %v263_v4 }
  0x2f   :  { %209 = vmatpush.msra.mxu1 %v189_v28  ;;  %277 = vmatpush.msra.mxu2 %v262_v6 }
  0x31   :  { %210 = vmatpush.msra.mxu1 %v188_v30  ;;  %278 = vmatpush.msra.mxu2 %v261_v8 }
  0x33   :  { %211 = vmatpush.msra.mxu1 %v187_v32 }
  0x35   :  { %212 = vmatpush.msra.mxu1 %v186_v34  ;;  %v199_v34 = vld [vmem:[#allocation10] sm:$0x7] }
  0x37   :  { %213 = vmatpush.msra.mxu1 %v185_v35 }
  0x39   :  { %214 = vmatpush.msra.mxu1 %v184_v37 }
  0x3b   :  { %215 = vmatpush.msra.mxu1 %v183_v39  ;;  %v250_v39 = vperm.slane %v199_v34, 2 }
  0x9c   :  { %v140_v9 = vpop.f32.mrf.mxu0 }
  0x9d   :  { %v143_v10 = vrot.slane %v140_v9, 4 }
  0x9f   :  { %v144_v13 = vadd.f32 %v143_v10, %v140_v9  ;;  %v260_v10 = vld [vmem:[#allocation11 + $0x38] sm:$0xff] }
  0xa0   :  { %279 = vmatpush.msra.mxu2 %v260_v10 }
  0xa1   :  { %v145_v15 = vrot.slane %v144_v13, 2 }
  0xa2   :  { %280 = vmatpush.msra.mxu2 %v259_v12 }
  0xa3   :  { %v146_v18 = vadd.f32 %v145_v15, %v144_v13 }
  0xa4   :  { %281 = vmatpush.msra.mxu2 %v258_v14 }
  0xa5   :  { %v147_v20 = vrot.slane %v146_v18, 1 }
  0xa6   :  { %282 = vmatpush.msra.mxu2 %v257_v16 }
  0xa7   :  { %v148_v23 = vadd.f32 %v147_v20, %v146_v18  ;;  %v256_v18 = vld [vmem:[#allocation11 + $0x18] sm:$0xff] }
  0xa8   :  { %283 = vmatpush.msra.mxu2 %v256_v18 }
  0xa9   :  { %v156_v25 = vmul.f32 %v584_v22, %v148_v23 }
  0xaa   :  { %284 = vmatpush.msra.mxu2 %v255_v19 }
  0xab   :  { %v157_v27 = vsub.f32 %v140_v9, %v156_v25 }
  0xac   :  { %285 = vmatpush.msra.mxu2 %v254_v21 }
  0xad   :  { %v158_v29 = vmul.f32 %v157_v27, %v157_v27 }
  0xae   :  { %286 = vmatpush.msra.mxu2 %v253_v24 }
  0xaf   :  { %v159_v31 = vrot.slane %v158_v29, 4 }
  0xb1   :  { %v160_v33 = vadd.f32 %v159_v31, %v158_v29 }
  0xb3   :  { %v161_v36 = vrot.slane %v160_v33, 2 }
  0xb5   :  { %v162_v38 = vadd.f32 %v161_v36, %v160_v33  ;;  %v248_v36 = vperm.slane %v199_v34, 1 }
  0xb7   :  { %v163_v40 = vrot.slane %v162_v38, 1 }
  0xb9   :  { %v164_v41 = vadd.f32 %v163_v40, %v162_v38 }
  0xbb   :  { %v165_v42 = vmul.f32 %v164_v41, %v584_v22 }
  0xbd   :  { %v166_v43 = vadd.f32 1e-05, %v165_v42 }
  0xbf   :  { %325 = vrsqrt.f32 %v166_v43  ;;  %vm173_vm3 = vweird.f32 %v166_v43 }
  0xc5   :  { %v326_v44 = vpop.eup %325 }
  0xc6   :  { %v168_v45 = vmul.f32 %v326_v44, %v166_v43  ;;  %vm174_vm2 = vweird.f32 %v326_v44 }
  0xc7   :  { %vm175_vm4 = vmor %vm173_vm3, %vm174_vm2 }
  0xc8   :  { %v169_v46 = vmul.f32 %v326_v44, %v168_v45 }
  0xca   :  { %v170_v47 = vmul.f32 0.5, %v169_v46 }
  0xcc   :  { %v171_v48 = vsub.f32 1.5, %v170_v47 }
  0xce   :  { %v172_v50 = vmul.f32 %v326_v44, %v171_v48 }
  0xd0   :  { %v176_v52 = vsel %vm175_vm4, %v326_v44, %v172_v50 }
  0xd1   :  { %v177_v53 = vmul.f32 %v176_v52, %v157_v27 }
  0xd3   :  { %v179_v55 = vmul.f32 %v178_v51, %v177_v53 }
  0xd5   :  { %v181_v56 = vadd.f32 %v180_v54, %v179_v55 }
  0xd7   :  { %v182_v57 = vmax.f32 %v181_v56, 0.0 }
  0xd9   :  { %216 = vmatmul.f32.vlgmr.msra.gmra.mxu1 %v182_v57 }
 0x156   :  { %v217_v60 = vpop.f32.mrf.mxu1 }
 0x157   :  { %v220_v61 = vrot.slane %v217_v60, 4 }
 0x159   :  { %v221_v63 = vadd.f32 %v220_v61, %v217_v60 }
 0x15b   :  { %v222_v1 = vrot.slane %v221_v63, 2 }
 0x15d   :  { %v223_v3 = vadd.f32 %v222_v1, %v221_v63 }
 0x15f   :  { %v224_v5 = vrot.slane %v223_v3, 1 }
 0x161   :  { %v225_v7 = vadd.f32 %v224_v5, %v223_v3 }
 0x163   :  { %v226_v9 = vmul.f32 %v225_v7, %v584_v22 }
 0x165   :  { %v227_v11 = vsub.f32 %v217_v60, %v226_v9 }
 0x167   :  { %v228_v13 = vmul.f32 %v227_v11, %v227_v11 }
 0x169   :  { %v229_v15 = vrot.slane %v228_v13, 4 }
 0x16b   :  { %v230_v17 = vadd.f32 %v229_v15, %v228_v13 }
 0x16d   :  { %v231_v20 = vrot.slane %v230_v17, 2 }
 0x16f   :  { %v232_v23 = vadd.f32 %v231_v20, %v230_v17 }
 0x171   :  { %v233_v25 = vrot.slane %v232_v23, 1 }
 0x173   :  { %v234_v26 = vadd.f32 %v233_v25, %v232_v23 }
 0x175   :  { %v235_v27 = vmul.f32 %v234_v26, %v584_v22  ;;  %v269_v22 = vld [vmem:[%s602_s6] sm:$0x7] }
 0x176   :  { %v270_v43 = vperm.slane %v269_v22, 0 }
 0x177   :  { %v236_v28 = vadd.f32 1e-05, %v235_v27 }
 0x179   :  { %327 = vrsqrt.f32 %v236_v28  ;;  %vm243_vm6 = vweird.f32 %v236_v28 }
 0x17f   :  { %v328_v29 = vpop.eup %327 }
 0x180   :  { %v238_v30 = vmul.f32 %v328_v29, %v236_v28  ;;  %vm244_vm5 = vweird.f32 %v328_v29 }
 0x181   :  { %vm245_vm7 = vmor %vm243_vm6, %vm244_vm5 }
 0x182   :  { %v239_v31 = vmul.f32 %v328_v29, %v238_v30 }
 0x184   :  { %v240_v32 = vmul.f32 0.5, %v239_v31 }
 0x186   :  { %v241_v33 = vsub.f32 1.5, %v240_v32 }
 0x188   :  { %v242_v35 = vmul.f32 %v328_v29, %v241_v33 }
 0x18a   :  { %v246_v37 = vsel %vm245_vm7, %v328_v29, %v242_v35 }
 0x18b   :  { %v247_v38 = vmul.f32 %v246_v37, %v227_v11 }
 0x18d   :  { %v249_v40 = vmul.f32 %v248_v36, %v247_v38 }
 0x18f   :  { %v251_v41 = vadd.f32 %v250_v39, %v249_v40 }
 0x191   :  { %v252_v42 = vmax.f32 %v251_v41, 0.0 }
 0x193   :  { %287 = vmatmul.f32.vlgmr.msra.gmra.mxu2 %v252_v42 }
 0x216   :  { %v288_v44 = vpop.f32.mrf.mxu2 }
 0x217   :  { %v289_v45 = vadd.f32 %v288_v44, %v270_v43 }
 0x219   :  { %291 = vst [vmem:[#allocation13] sm:$0xff] %v289_v45 }
 0x21a   :  { %302 = dma.vmem_to_hbm [thread:$0]  %s298_s30, 128, %s300_s10, [#allocation4]  }
 0x21b   :  { %505 = dma.done.wait [#allocation4], 128  }
 0x21c   :  { %506 = vsyncadd [#allocation4], 4294967168 }
 0x21d   :  { %307 = vsyncpa [#allocation3], 1 }
 0x21e   :  { %308 = vsyncpa [#allocation6], 1 }
 0x21f   :  { %309 = vsyncpa [#allocation9], 1 }
 0x220   :  { %310 = vsyncpa [#allocation12], 1 }
 0x221   :  { %311 = vsyncpa [#allocation4], 1 }

</bundles_post_ra>
